<compile_context>
chip_gen: v5e
topology: v5e:2x2
jax: 0.10.0
libtpu: 0.0.40
codegen_flags: <defaults>
</compile_context>

<pallas_src>
import jax
import jax.numpy as jnp
from jax import lax
from jax.experimental import pallas as pl
from jax.experimental.pallas import tpu as pltpu


# ----------------------------- kernel body --------------------------------- #
def _linear_kernel(x_ref, w_ref, b_ref, o_ref, acc_ref):
    # x_ref: (tm, tk)   w_ref: (tn, tk)   b_ref: (1, tn)
    # o_ref: (tm, tn)   acc_ref: (tm, tn) f32 scratch
    k = pl.program_id(2)

    @pl.when(k == 0)
    def _():
        # Fold the bias into the accumulator init — removes a full-tile VPU
        # add (and the f32 cast of bias) from the epilogue path.
        acc_ref[...] = jnp.broadcast_to(
            b_ref[...].astype(jnp.float32), acc_ref.shape
        )

    # Contract dim 1 of x with dim 1 of w  ->  x @ W^T  (MXU, f32 accumulate).
    # Keeps the PyTorch (N, K) weight layout; no HBM-side transpose.
    acc_ref[...] += lax.dot_general(
        x_ref[...], w_ref[...],
        dimension_numbers=(((1,), (1,)), ((), ())),
        preferred_element_type=jnp.float32,
    )

    @pl.when(k == pl.num_programs(2) - 1)
    def _():
        o_ref[...] = acc_ref[...].astype(o_ref.dtype)


# ------------------------------ helpers ------------------------------------ #
def _round_up(v, m):
    return ((v + m - 1) // m) * m


# Minimum sublane granularity per element size (packing along sublanes).
_SUBLANE_BY_ITEMSIZE = {4: 8, 2: 16, 1: 32}


def _vmem_capacity_bytes():
    """Best-effort query of per-core VMEM; fall back to the smallest (v7x)."""
    try:
        return int(pltpu.get_tpu_info().vmem_capacity_bytes)
    except Exception:
        return 64 * 1024 * 1024  # conservative: v7x per-TensorCore VMEM


def _default_config():
    """Generation-tuned (tm, tn, tk, vmem_limit_bytes)."""
    vmem = _vmem_capacity_bytes()
    if vmem >= 100 * 1024 * 1024:
        # v5e / v6e: 128 MiB VMEM, lower HBM BW -> spend VMEM on reuse.
        # Working set ~18 MiB (2x x-buf 4 MiB, 2x W-buf 8 MiB, acc 2 MiB,
        # 2x out-buf 4 MiB) with generous vmem headroom.
        return 512, 1024, 1024, 96 * 1024 * 1024
    # v7x: 64 MiB per TensorCore -> cap working set (~11 MiB) and limit.
    return 512, 512, 1024, 48 * 1024 * 1024


# ------------------------------ wrapper ------------------------------------ #
def linear(x, weight, bias, *, tm=None, tn=None, tk=None,
           vmem_limit_bytes=None):
    """nn.Linear forward via Pallas.

    x:      (M, dim_in)
    weight: (dim_out, dim_in)  -- PyTorch convention, NOT transposed here
    bias:   (dim_out,)
    returns (M, dim_out)
    """
    M, K = x.shape
    N, K2 = weight.shape
    assert K == K2 and bias.shape == (N,)

    d_tm, d_tn, d_tk, d_vmem = _default_config()
    tm = d_tm if tm is None else tm
    tn = d_tn if tn is None else tn
    tk = d_tk if tk is None else tk
    vmem_limit_bytes = d_vmem if vmem_limit_bytes is None else vmem_limit_bytes

    # Clamp tiles to the (hardware-aligned) problem size so tiny problems
    # don't over-pad. Sublane granularity is dtype-aware; lanes stay 128.
    sub = _SUBLANE_BY_ITEMSIZE.get(jnp.dtype(x.dtype).itemsize, 8)
    tm = min(tm, _round_up(M, sub))
    tn = min(tn, _round_up(N, 128))
    tk = min(tk, _round_up(K, 128))

    Mp, Np, Kp = _round_up(M, tm), _round_up(N, tn), _round_up(K, tk)

    # Pad only when needed; tile-aligned shapes (the common case once the
    # caller pre-pads the reused weight) take the zero-copy path.
    # TODO(synk): for very large unaligned weights, pre-pad/persist W outside
    # the per-call path to avoid re-reading it through an XLA pad each call.
    x_p = x if (Mp == M and Kp == K) else jnp.pad(x, ((0, Mp - M), (0, Kp - K)))
    w_p = weight if (Np == N and Kp == K) else jnp.pad(
        weight, ((0, Np - N), (0, Kp - K)))
    b_p = (bias if Np == N else jnp.pad(bias, (0, Np - N))).reshape(1, Np)

    grid = (Mp // tm, Np // tn, Kp // tk)

    itemsize = jnp.dtype(x.dtype).itemsize
    cost = pl.CostEstimate(
        flops=2 * M * N * K,
        transcendentals=0,
        bytes_accessed=(M * K + N * K + M * N + N) * itemsize,
    )

    out = pl.pallas_call(
        _linear_kernel,
        out_shape=jax.ShapeDtypeStruct((Mp, Np), x.dtype),
        grid_spec=pltpu.PrefetchScalarGridSpec(
            num_scalar_prefetch=0,
            grid=grid,
            in_specs=[
                pl.BlockSpec((tm, tk), lambda i, j, k: (i, k)),   # x tile
                pl.BlockSpec((tn, tk), lambda i, j, k: (j, k)),   # W tile (N,K)
                pl.BlockSpec((1, tn), lambda i, j, k: (0, j)),    # bias tile
            ],
            out_specs=pl.BlockSpec((tm, tn), lambda i, j, k: (i, j)),
            scratch_shapes=[pltpu.VMEM((tm, tn), jnp.float32)],
        ),
        compiler_params=pltpu.CompilerParams(
            dimension_semantics=("parallel", "parallel", "arbitrary"),
            vmem_limit_bytes=vmem_limit_bytes,
        ),
        cost_estimate=cost,
    )(x_p, w_p, b_p)

    if Mp != M or Np != N:
        out = out[:M, :N]
    return out


# ------------------------------- demo --------------------------------------- #
if __name__ == "__main__":
    # Small shapes consistent with the module's forward.
    batch, dim_in, dim_out = 8, 32, 64

    key = jax.random.PRNGKey(0)
    kx, kw, kb = jax.random.split(key, 3)

    x = jax.random.normal(kx, (batch, dim_in), dtype=jnp.float32)
    # nn.Linear-style uniform(-1/sqrt(in), 1/sqrt(in)) init.
    bound = 1.0 / (dim_in ** 0.5)
    weight = jax.random.uniform(kw, (dim_out, dim_in), jnp.float32, -bound, bound)
    bias = jax.random.uniform(kb, (dim_out,), jnp.float32, -bound, bound)

    y = jax.block_until_ready(linear(x, weight, bias))
    y_ref = x @ weight.T + bias
    assert y.shape == (batch, dim_out)
    assert jnp.allclose(y, y_ref, atol=1e-5, rtol=1e-5)

    # Non-tile-aligned, K-tiled shape: exercises accumulator + padding path
    # with small explicit tiles so the K grid has multiple steps.
    M2, K2_, N2 = 100, 1000, 300
    kx2, kw2, kb2 = jax.random.split(jax.random.PRNGKey(1), 3)
    x2 = jax.random.normal(kx2, (M2, K2_), dtype=jnp.float32)
    w2 = jax.random.normal(kw2, (N2, K2_), dtype=jnp.float32) * 0.02
    b2 = jax.random.normal(kb2, (N2,), dtype=jnp.float32)
    y2 = jax.block_until_ready(linear(x2, w2, b2, tm=64, tn=128, tk=256))
    y2_ref = x2 @ w2.T + b2
    assert jnp.allclose(y2, y2_ref, atol=1e-3, rtol=1e-3)

    # Larger, tile-aligned shape: exercises the default (generation-tuned)
    # tile config and the zero-copy (no pad) path.
    M3, K3, N3 = 1024, 2048, 1024
    kx3, kw3, kb3 = jax.random.split(jax.random.PRNGKey(2), 3)
    x3 = jax.random.normal(kx3, (M3, K3), dtype=jnp.float32)
    w3 = jax.random.normal(kw3, (N3, K3), dtype=jnp.float32) * 0.02
    b3 = jax.random.normal(kb3, (N3,), dtype=jnp.float32)
    y3 = jax.block_until_ready(linear(x3, w3, b3))
    y3_ref = x3 @ w3.T + b3
    assert jnp.allclose(y3, y3_ref, atol=2e-2, rtol=2e-2)

    print("KERNEL_OK")
</pallas_src>

<mosaic_0001>
module attributes {stable_mosaic.version = 11 : i64} {
  func.func @_linear_kernel(%arg0: i32, %arg1: i32, %arg2: i32, %arg3: memref<8x128xf32, #tpu.memory_space<vmem>>, %arg4: memref<128x128xf32, #tpu.memory_space<vmem>>, %arg5: memref<1x128xf32, #tpu.memory_space<vmem>>, %arg6: memref<8x128xf32, #tpu.memory_space<vmem>>, %arg7: memref<8x128xf32, #tpu.memory_space<vmem>>) attributes {dimension_semantics = [#tpu.dimension_semantics<parallel>, #tpu.dimension_semantics<parallel>, #tpu.dimension_semantics<arbitrary>], iteration_bounds = array<i64: 1, 1, 1>, scalar_prefetch = 0 : i64, scratch_operands = 1 : i64, tpu.core_type = #tpu.core_type<tc>, window_params = [{transform_indices = @transform_0, window_bounds = array<i64: 8, 128>}, {transform_indices = @transform_1, window_bounds = array<i64: 128, 128>}, {transform_indices = @transform_2, window_bounds = array<i64: 1, 128>}, {transform_indices = @transform_3, window_bounds = array<i64: 8, 128>}]} {
    %c0_i32 = arith.constant 0 : i32
    %0 = arith.cmpi eq, %arg2, %c0_i32 : i32
    %1 = arith.extui %0 : i1 to i32
    %c0_i32_0 = arith.constant 0 : i32
    %2 = arith.cmpi ne, %1, %c0_i32_0 : i32
    scf.if %2 {
      %c0_10 = arith.constant 0 : index
      %c0_11 = arith.constant 0 : index
      %12 = vector.load %arg5[%c0_10, %c0_11] : memref<1x128xf32, #tpu.memory_space<vmem>>, vector<1x128xf32>
      %13 = vector.shape_cast %12 : vector<1x128xf32> to vector<1x128xf32>
      %14 = vector.broadcast %13 : vector<1x128xf32> to vector<8x128xf32>
      %c0_12 = arith.constant 0 : index
      %c0_13 = arith.constant 0 : index
      %15 = vector.load %arg7[%c0_12, %c0_13] : memref<8x128xf32, #tpu.memory_space<vmem>>, vector<8x128xf32>
      tpu.vector_store %arg7[%c0_12, %c0_13], %14 {strides = array<i32>} : memref<8x128xf32, #tpu.memory_space<vmem>>, vector<8x128xf32>,
    } else {
    }
    %c0 = arith.constant 0 : index
    %c0_1 = arith.constant 0 : index
    %3 = vector.load %arg7[%c0, %c0_1] : memref<8x128xf32, #tpu.memory_space<vmem>>, vector<8x128xf32>
    %c0_2 = arith.constant 0 : index
    %c0_3 = arith.constant 0 : index
    %4 = vector.load %arg3[%c0_2, %c0_3] : memref<8x128xf32, #tpu.memory_space<vmem>>, vector<8x128xf32>
    %c0_4 = arith.constant 0 : index
    %c0_5 = arith.constant 0 : index
    %5 = vector.load %arg4[%c0_4, %c0_5] : memref<128x128xf32, #tpu.memory_space<vmem>>, vector<128x128xf32>
    %cst = arith.constant dense<0.000000e+00> : vector<8x128xf32>
    %6 = tpu.matmul %4, %5, %cst {dimension_numbers = #tpu.dot_dimension_numbers<[1], [1], [0], [0], [0, 0, 1, 0], [], []>} : vector<8x128xf32>, vector<128x128xf32>, vector<8x128xf32> -> vector<8x128xf32>
    %7 = arith.addf %3, %6 : vector<8x128xf32>
    %c0_6 = arith.constant 0 : index
    %c0_7 = arith.constant 0 : index
    %8 = vector.load %arg7[%c0_6, %c0_7] : memref<8x128xf32, #tpu.memory_space<vmem>>, vector<8x128xf32>
    tpu.vector_store %arg7[%c0_6, %c0_7], %7 {strides = array<i32>} : memref<8x128xf32, #tpu.memory_space<vmem>>, vector<8x128xf32>,
    %c0_i32_8 = arith.constant 0 : i32
    %9 = arith.cmpi eq, %arg2, %c0_i32_8 : i32
    %10 = arith.extui %9 : i1 to i32
    %c0_i32_9 = arith.constant 0 : i32
    %11 = arith.cmpi ne, %10, %c0_i32_9 : i32
    scf.if %11 {
      %c0_10 = arith.constant 0 : index
      %c0_11 = arith.constant 0 : index
      %12 = vector.load %arg7[%c0_10, %c0_11] : memref<8x128xf32, #tpu.memory_space<vmem>>, vector<8x128xf32>
      %c0_12 = arith.constant 0 : index
      %c0_13 = arith.constant 0 : index
      %13 = vector.load %arg6[%c0_12, %c0_13] : memref<8x128xf32, #tpu.memory_space<vmem>>, vector<8x128xf32>
      tpu.vector_store %arg6[%c0_12, %c0_13], %12 {strides = array<i32>} : memref<8x128xf32, #tpu.memory_space<vmem>>, vector<8x128xf32>,
    } else {
    }
    return
  }
  func.func @transform_0(%arg0: i32, %arg1: i32, %arg2: i32) -> (i32, i32) {
    %c0_i32 = arith.constant 0 : i32
    return %arg0, %arg2 : i32, i32
  }
  func.func @transform_1(%arg0: i32, %arg1: i32, %arg2: i32) -> (i32, i32) {
    %c0_i32 = arith.constant 0 : i32
    return %arg1, %arg2 : i32, i32
  }
  func.func @transform_2(%arg0: i32, %arg1: i32, %arg2: i32) -> (i32, i32) {
    %c0_i32 = arith.constant 0 : i32
    %c0_i32_0 = arith.constant 0 : i32
    return %c0_i32, %arg1 : i32, i32
  }
  func.func @transform_3(%arg0: i32, %arg1: i32, %arg2: i32) -> (i32, i32) {
    %c0_i32 = arith.constant 0 : i32
    return %arg0, %arg1 : i32, i32
  }
}

</mosaic_0001>

<bundles_post_ra>
// kernel: tpu_custom_call.1
= control target key start
LH: loop header
LB: loop body
LE: loop exit
PB: predicated region body
PF: predicated region fallthrough
CT: control target
= control target key end

     0   :  { %8 = vsyncpa [#allocation4], 0  ;;  %s238_s0 = inlined_call_operand.hbm [shape: f32[8,128], index: 0, kind: input, shape index: {}]   ;;  %s239_s1 = inlined_call_operand.hbm [shape: f32[128,128], index: 1, kind: input, shape index: {}]   ;;  %s240_s2 = inlined_call_operand.vmem [shape: f32[1,128], index: 2, kind: input, shape index: {}]   ;;  %s241_s3 = inlined_call_operand.hbm [shape: f32[8,128], index: 3, kind: output, shape index: {}]  }
   0x1   :  { %9 = vsyncpa [#allocation7], 0 }
   0x2   :  { %10 = vsyncpa [#allocation5], 0  ;;  %s16_s14 = sshll.u32 %s238_s0, 4  ;;  %s201_s15 = smov [#allocation3]   ;;  %s17_s14 = int_to_ptr.hbm [resolvable:$true] %s16_s14 }
   0x3   :  { %s18_s16 = sshll.u32 %s201_s15, 4  ;;  %s26_s19 = sshll.u32 %s239_s1, 4  ;;  %s19_s16 = int_to_ptr.vmem [resolvable:$true] %s18_s16  ;;  %s27_s19 = int_to_ptr.hbm [resolvable:$true] %s26_s19 }
   0x4   :  { %21 = dma.hbm_to_vmem [thread:$0]  %s17_s14, 128, %s19_s16, [#allocation4]  }
   0x5   :  { %s202_s20 = smov [#allocation6]   ;;  %s203_s22 = smov 128  }
   0x6   :  { %s28_s21 = sshll.u32 %s202_s20, 4  ;;  %s204_s23 = smov 8   ;;  %s29_s21 = int_to_ptr.vmem [resolvable:$true] %s28_s21 }
   0x7   :  { %34 = dma.hbm_to_vmem [thread:$0]  %s27_s19, 2048, %s29_s21, [#allocation7], %s203_s22, %s203_s22, %s204_s23  }
   0x8   :  { %195 = dma.done.wait [#allocation4], 128  }
   0x9   :  { %196 = vsyncadd [#allocation4], 4294967168 }
   0xa   :  { %197 = dma.done.wait [#allocation7], 2048  }
   0xb   :  { %198 = vsyncadd [#allocation7], 4294965248  ;;  %v71_v0 = vld [vmem:[#allocation6 + $0x78] sm:$0xff]  ;;  %v70_v1 = vld [vmem:[#allocation6 + $0x70] sm:$0xff]  ;;  %s205_s24 = smov [#allocation8]   ;;  %s106_s28 = sshll.u32 %s241_s3, 4  ;;  %s107_s28 = int_to_ptr.hbm [resolvable:$true] %s106_s28 }
   0xc   :  { %72 = vmatpush.xpose.msra.mxu0 %v71_v0  ;;  %v69_v2 = vld [vmem:[#allocation6 + $0x68] sm:$0xff]  ;;  %v68_v3 = vld [vmem:[#allocation6 + $0x60] sm:$0xff]  ;;  %v67_v4 = vld [vmem:[#allocation6 + $0x58] sm:$0xff]  ;;  %s104_s25 = sshll.u32 %s205_s24, 4  ;;  %s105_s25 = int_to_ptr.vmem [resolvable:$true] %s104_s25 }
   0xd   :  { %v66_v5 = vld [vmem:[#allocation6 + $0x50] sm:$0xff]  ;;  %v65_v6 = vld [vmem:[#allocation6 + $0x48] sm:$0xff]  ;;  %v64_v7 = vld [vmem:[#allocation6 + $0x40] sm:$0xff] }
   0xe   :  { %v63_v8 = vld [vmem:[#allocation6 + $0x38] sm:$0xff]  ;;  %v62_v9 = vld [vmem:[#allocation6 + $0x30] sm:$0xff]  ;;  %v61_v10 = vld [vmem:[#allocation6 + $0x28] sm:$0xff] }
   0xf   :  { %v60_v11 = vld [vmem:[#allocation6 + $0x20] sm:$0xff]  ;;  %v59_v12 = vld [vmem:[#allocation6 + $0x18] sm:$0xff]  ;;  %v58_v13 = vld [vmem:[#allocation6 + $0x10] sm:$0xff] }
  0x10   :  { %73 = vmatpush.xpose.msra.mxu0 %v70_v1  ;;  %v57_v14 = vld [vmem:[#allocation6 + $0x8] sm:$0xff]  ;;  %v56_v15 = vld [vmem:[#allocation6] sm:$0xff]  ;;  %v55_v16 = vld [vmem:[#allocation3] sm:$0xff] }
  0x11   :  { %v122_v17 = vld [vmem:[%s240_s2] ss:$0 sm:$0xff] }
  0x14   :  { %74 = vmatpush.xpose.msra.mxu0 %v69_v2 }
  0x18   :  { %75 = vmatpush.xpose.msra.mxu0 %v68_v3 }
  0x1c   :  { %76 = vmatpush.xpose.msra.mxu0 %v67_v4 }
  0x20   :  { %77 = vmatpush.xpose.msra.mxu0 %v66_v5 }
  0x24   :  { %78 = vmatpush.xpose.msra.mxu0 %v65_v6 }
  0x28   :  { %79 = vmatpush.xpose.msra.mxu0 %v64_v7 }
  0x2c   :  { %80 = vmatpush.xpose.msra.mxu0 %v63_v8 }
  0x30   :  { %81 = vmatpush.xpose.msra.mxu0 %v62_v9 }
  0x34   :  { %82 = vmatpush.xpose.msra.mxu0 %v61_v10 }
  0x38   :  { %83 = vmatpush.xpose.msra.mxu0 %v60_v11 }
  0x3c   :  { %84 = vmatpush.xpose.msra.mxu0 %v59_v12 }
  0x40   :  { %85 = vmatpush.xpose.msra.mxu0 %v58_v13 }
  0x44   :  { %86 = vmatpush.xpose.msra.mxu0 %v57_v14 }
  0x48   :  { %87 = vmatpush.xpose.msra.mxu0 %v56_v15 }
  0x4b   :  { %88 = vmatmul.f32.vlgmr.msra.gmra.mxu0 %v55_v16 }
  0xc8   :  { %v89_v18 = vpop.f32.mrf.mxu0 }
  0xc9   :  { %v92_v19 = vadd.f32 %v122_v17, %v89_v18 }
  0xcb   :  { %98 = vst [vmem:[#allocation8] sm:$0xff] %v92_v19 }
  0xcc   :  { %109 = dma.vmem_to_hbm [thread:$0]  %s105_s25, 128, %s107_s28, [#allocation5]  }
  0xcd   :  { %199 = dma.done.wait [#allocation5], 128  }
  0xce   :  { %200 = vsyncadd [#allocation5], 4294967168 }
  0xcf   :  { %114 = vsyncpa [#allocation4], 1 }
  0xd0   :  { %115 = vsyncpa [#allocation7], 1 }
  0xd1   :  { %116 = vsyncpa [#allocation5], 1 }

</bundles_post_ra>
